<compile_context>
chip_gen: v7x
topology: tpu7x:2x2x1
jax: 0.10.0
libtpu: 0.0.40
codegen_flags: <defaults>
</compile_context>

<pallas_src>
import functools

import jax
import jax.numpy as jnp
from jax import lax
from jax.experimental import pallas as pl
from jax.experimental.pallas import tpu as pltpu


# ----------------------------------------------------------------------------
# Pallas kernel: fused (W2 @ patchesT + b) -> LeakyReLU(0.2), lane-dense output
# ----------------------------------------------------------------------------
def _conv_block_kernel(p_ref, w_ref, b_ref, o_ref, *, negative_slope):
    # p_ref: (Cin*K*K, Ho*Wo)   w_ref: (Cout, Cin*K*K)
    # b_ref: (Cout, 1)          o_ref: (Cout, Ho*Wo)   -- Ho*Wo is the lane axis
    y = jnp.dot(w_ref[...], p_ref[...], preferred_element_type=jnp.float32)
    y = y + b_ref[...]                                  # bias (fp32)
    y = jnp.where(y > 0, y, negative_slope * y)         # LeakyReLU(0.2), fp32
    o_ref[...] = y.astype(o_ref.dtype)


# ----------------------------------------------------------------------------
# ConvBlock wrapper (NCHW in / NCHW out, like PyTorch)
# ----------------------------------------------------------------------------
def conv_block_forward(x_nchw, weight_oihw, bias, *, stride=1, negative_slope=0.2):
    N, Cin, H, W = x_nchw.shape
    Cout, _, K, _ = weight_oihw.shape
    pad = K // 2
    Ho = (H + 2 * pad - K) // stride + 1
    Wo = (W + 2 * pad - K) // stride + 1
    HW = Ho * Wo
    CKK = Cin * K * K

    # --- glue: shifted-slice stack, already in (N, K*K*Cin, Ho*Wo) order -----
    xp = jnp.pad(x_nchw, ((0, 0), (0, 0), (pad, pad), (pad, pad)))
    cols = [
        xp[:, :, kh:kh + stride * Ho:stride, kw:kw + stride * Wo:stride]
        for kh in range(K) for kw in range(K)
    ]                                                    # each (N, Cin, Ho, Wo)
    # (N, K*K, Cin, Ho, Wo) -> (N, K*K*Cin, Ho*Wo): contiguous merges only.
    patches_t = jnp.stack(cols, axis=1).reshape(N, CKK, HW)

    # Weight (Cout, Cin, K, K) -> (Cout, K*K*Cin), matching tap-major ordering.
    w2 = weight_oihw.transpose(0, 2, 3, 1).reshape(Cout, CKK)
    b_col = bias.reshape(Cout, 1).astype(jnp.float32)

    kernel = functools.partial(_conv_block_kernel, negative_slope=negative_slope)

    out = pl.pallas_call(
        kernel,
        out_shape=jax.ShapeDtypeStruct((N, Cout, HW), jnp.float32),
        grid_spec=pltpu.PrefetchScalarGridSpec(
            num_scalar_prefetch=0,
            grid=(N,),                                   # one step per image
            in_specs=[
                pl.BlockSpec((None, CKK, HW), lambda n: (n, 0, 0)),  # patchesT
                pl.BlockSpec((Cout, CKK), lambda n: (0, 0)),         # weights
                pl.BlockSpec((Cout, 1), lambda n: (0, 0)),           # bias col
            ],
            out_specs=pl.BlockSpec((None, Cout, HW), lambda n: (n, 0, 0)),
        ),
        compiler_params=pltpu.CompilerParams(
            dimension_semantics=("parallel",)),          # shard over TCs (v7x)
    )(patches_t, w2, b_col)

    # (N, Cout, Ho*Wo) is already NCHW-contiguous -> free reshape.
    return out.reshape(N, Cout, Ho, Wo)


# ----------------------------------------------------------------------------
# Pure-JAX reference (for correctness check)
# ----------------------------------------------------------------------------
def _reference_forward(x, w, b, *, stride=1, negative_slope=0.2):
    K = w.shape[2]
    pad = K // 2
    y = lax.conv_general_dilated(
        x, w, window_strides=(stride, stride),
        padding=((pad, pad), (pad, pad)),
        dimension_numbers=("NCHW", "OIHW", "NCHW"))
    y = y + b.reshape(1, -1, 1, 1)
    return jnp.where(y > 0, y, negative_slope * y)


if __name__ == "__main__":
    # Deterministic parameter / input construction (synthetic, PyTorch-like shapes).
    input_ch, output_ch, kernel_size, stride = 4, 8, 3, 1
    N, H, W = 2, 16, 16

    key = jax.random.PRNGKey(0)
    kx, kw, kb = jax.random.split(key, 3)

    x = jax.random.normal(kx, (N, input_ch, H, W), dtype=jnp.float32)
    fan_in = input_ch * kernel_size * kernel_size
    bound = 1.0 / jnp.sqrt(fan_in)
    weight = jax.random.uniform(
        kw, (output_ch, input_ch, kernel_size, kernel_size),
        minval=-bound, maxval=bound, dtype=jnp.float32)
    bias = jax.random.uniform(
        kb, (output_ch,), minval=-bound, maxval=bound, dtype=jnp.float32)

    out = conv_block_forward(x, weight, bias, stride=stride)
    out = jax.block_until_ready(out)

    ref = _reference_forward(x, weight, bias, stride=stride)
    assert out.shape == (N, output_ch, H, W), out.shape
    assert jnp.allclose(out, ref, atol=1e-4, rtol=1e-4), (
        float(jnp.max(jnp.abs(out - ref))))

    print("KERNEL_OK")
</pallas_src>

<mosaic_0001>
module attributes {stable_mosaic.version = 11 : i64} {
  func.func @_conv_block_kernel(%arg0: i32, %arg1: memref<1x36x256xf32, #tpu.memory_space<vmem>>, %arg2: memref<8x36xf32, #tpu.memory_space<vmem>>, %arg3: memref<8x1xf32, #tpu.memory_space<vmem>>, %arg4: memref<1x8x256xf32, #tpu.memory_space<vmem>>) attributes {dimension_semantics = [#tpu.dimension_semantics<parallel>], iteration_bounds = array<i64: 2>, scalar_prefetch = 0 : i64, scratch_operands = 0 : i64, tpu.core_type = #tpu.core_type<tc>, window_params = [{transform_indices = @transform_0, window_bounds = array<i64: 1, 36, 256>}, {pipeline_mode = #tpu.pipeline_mode<synchronous>, transform_indices = @transform_1, window_bounds = array<i64: 8, 36>}, {pipeline_mode = #tpu.pipeline_mode<synchronous>, transform_indices = @transform_2, window_bounds = array<i64: 8, 1>}, {transform_indices = @transform_3, window_bounds = array<i64: 1, 8, 256>}]} {
    %c0 = arith.constant 0 : index
    %c0_0 = arith.constant 0 : index
    %0 = vector.load %arg2[%c0, %c0_0] : memref<8x36xf32, #tpu.memory_space<vmem>>, vector<8x36xf32>
    %c0_1 = arith.constant 0 : index
    %c0_2 = arith.constant 0 : index
    %c0_3 = arith.constant 0 : index
    %1 = vector.load %arg1[%c0_1, %c0_2, %c0_3] : memref<1x36x256xf32, #tpu.memory_space<vmem>>, vector<1x36x256xf32>
    %2 = vector.shape_cast %1 : vector<1x36x256xf32> to vector<36x256xf32>
    %cst = arith.constant dense<0.000000e+00> : vector<8x256xf32>
    %3 = tpu.matmul %0, %2, %cst {dimension_numbers = #tpu.dot_dimension_numbers<[1], [0], [0], [1], [0, 0, 1, 1], [], []>} : vector<8x36xf32>, vector<36x256xf32>, vector<8x256xf32> -> vector<8x256xf32>
    %c0_4 = arith.constant 0 : index
    %c0_5 = arith.constant 0 : index
    %4 = vector.load %arg3[%c0_4, %c0_5] : memref<8x1xf32, #tpu.memory_space<vmem>>, vector<8x1xf32>
    %5 = vector.broadcast %4 : vector<8x1xf32> to vector<8x256xf32>
    %6 = arith.addf %3, %5 : vector<8x256xf32>
    %cst_6 = arith.constant 0.000000e+00 : f32
    %7 = vector.broadcast %cst_6 : f32 to vector<8x256xf32>
    %8 = arith.cmpf ogt, %6, %7 : vector<8x256xf32>
    %cst_7 = arith.constant 2.000000e-01 : f32
    %9 = vector.broadcast %cst_7 : f32 to vector<8x256xf32>
    %10 = arith.mulf %9, %6 : vector<8x256xf32>
    %11 = arith.select %8, %6, %10 : vector<8x256xi1>, vector<8x256xf32>
    %c0_8 = arith.constant 0 : index
    %c0_9 = arith.constant 0 : index
    %c0_10 = arith.constant 0 : index
    %12 = vector.load %arg4[%c0_8, %c0_9, %c0_10] : memref<1x8x256xf32, #tpu.memory_space<vmem>>, vector<1x8x256xf32>
    %13 = vector.shape_cast %12 : vector<1x8x256xf32> to vector<8x256xf32>
    %14 = vector.shape_cast %11 : vector<8x256xf32> to vector<1x8x256xf32>
    tpu.vector_store %arg4[%c0_8, %c0_9, %c0_10], %14 {strides = array<i32>} : memref<1x8x256xf32, #tpu.memory_space<vmem>>, vector<1x8x256xf32>,
    return
  }
  func.func @transform_0(%arg0: i32) -> (i32, i32, i32) {
    %c0_i32 = arith.constant 0 : i32
    %c0_i32_0 = arith.constant 0 : i32
    %c0_i32_1 = arith.constant 0 : i32
    return %arg0, %c0_i32, %c0_i32_0 : i32, i32, i32
  }
  func.func @transform_1(%arg0: i32) -> (i32, i32) {
    %c0_i32 = arith.constant 0 : i32
    %c0_i32_0 = arith.constant 0 : i32
    %c0_i32_1 = arith.constant 0 : i32
    return %c0_i32, %c0_i32_0 : i32, i32
  }
  func.func @transform_2(%arg0: i32) -> (i32, i32) {
    %c0_i32 = arith.constant 0 : i32
    %c0_i32_0 = arith.constant 0 : i32
    %c0_i32_1 = arith.constant 0 : i32
    return %c0_i32, %c0_i32_0 : i32, i32
  }
  func.func @transform_3(%arg0: i32) -> (i32, i32, i32) {
    %c0_i32 = arith.constant 0 : i32
    %c0_i32_0 = arith.constant 0 : i32
    %c0_i32_1 = arith.constant 0 : i32
    return %arg0, %c0_i32, %c0_i32_0 : i32, i32, i32
  }
}

</mosaic_0001>

<bundles_post_ra>
// kernel: tpu_custom_call.1
= control target key start
LH: loop header
LB: loop body
LE: loop exit
PB: predicated region body
PF: predicated region fallthrough
CT: control target
= control target key end

     0   :  { %8 = vsyncpa [#allocation3], 0  ;;  %s609_s0 = inlined_call_operand.vmem [shape: f32[2,36,256], index: 0, kind: input, shape index: {}]   ;;  %s610_s1 = inlined_call_operand.vmem [shape: f32[8,36], index: 1, kind: input, shape index: {}]   ;;  %s611_s2 = inlined_call_operand.vmem [shape: f32[8,1], index: 2, kind: input, shape index: {}]   ;;  %s612_s3 = inlined_call_operand.hbm [shape: f32[2,8,256], index: 3, kind: output, shape index: {}]  }
   0x1   :  { %10 = vsyncpa [#allocation3 + $0x1], 0  ;;  %s503_s12 = smov 0   ;;  %s505_s13 = smov 0  }
   0x2   :  { %s507_s14 = smov 0   ;;  %s509_s15 = smov 0  }
   0x3 LB: > { %s524_s16 = sadd.s32 4294967295, %s478_s15   ;;  %s350_s17 = sadd.s32 4294967294, %s478_s15   ;;  %s478_s15 = sphi %s509_s15, %s618_s15   ;;  %s474_s14 = sphi %s507_s14, %s617_s14   ;;  %s470_s13 = sphi %s505_s13, %s616_s13   ;;  %s466_s12 = sphi %s503_s12, %s615_s12  }
   0x4   : > { %s528_s18 = sadd.s32 1, %s478_s15   ;;  %s91_s19 = sadd.s32 1, %s474_s14 }
   0x5   : > { %s88_s20 = ssub.s32 %s478_s15, %s528_s18  ;;  %p101_p0 = scmp.ne.s32.totalorder %s474_s14, %s470_s13 }
   0x6   : > { %p89_p1 = scmp.eq.s32.totalorder %s88_s20, 0  ;;  %p102_p2 = scmp.eq.s32.totalorder %s524_s16, 1 }
   0x7   : > { %p107_p3 = scmp.ne.s32.totalorder %s470_s13, %s466_s12  ;;  %p108_p4 = scmp.eq.s32.totalorder %s350_s17, 1 }
   0x8   : > { %s539_s21 = scalar_select %p89_p1, %s474_s14, %s91_s19  }
   0x9   : > { %p541_p5 = por %p102_p2, %p101_p0  ;;  %p545_p6 = por %p108_p4, %p107_p3 }
   0xa   : > { %p353_p7 = scmp.ge.s32.totalorder %s478_s15, 1  ;;  %p140_p8 = scmp.lt.s32.totalorder %s478_s15, 3 }
   0xc   : > { %p141_p9 = pnand %p353_p7, %p140_p8 }
   0xd   : > { %p164_p10 = scmp.lt.s32.totalorder (!%p141_p9), %s524_s16, 1  ;;  %v480_v0 = vmov (!%p141_p9), 0.0   ;;  %v481_v1 = vmov (!%p141_p9), 0   ;;  %v180_v2 = vld [vmem:[%s611_s2] sm:$0xff] (!%p141_p9)  ;;  %vm190_vm0 = vcmask (!%p141_p9), 1043456   ;;  %vm186_vm1 = vcmask (!%p141_p9), 293888  }
   0xe   : > { %144 = sbr.rel (%p141_p9) target bundleno = 271 (0x10f), region = 32  ;;  %261 = vmatprep.mubr.f32.mxu0 (!%p141_p9), %v480_v0  ;;  %415 = vset.pattern.permute.xlu0 (!%p141_p9), %v481_v1  ;;  %v169_v17 = vld [vmem:[%s610_s1] sm:$0xff] (!%p141_p9)  ;;  %s161_s6 = sand.u32 (!%p141_p9), 1, %s470_s13  }
   0xf   : > { %183 = vperm.xlu0 (!%p141_p9), %415, %v180_v2   ;;  %s354_s7 = sshll.u32 (!%p141_p9), %s161_s6, 4  ;;  %s364_s8 = sshll.u32 (!%p141_p9), %s524_s16, 8 }
  0x10   : > { %s163_s9 = scalar_lea.vmem (!%p141_p9), [#allocation2], %s354_s7  ;;  %s567_s19 = scalar_lea.hbm (!%p141_p9), %s612_s3, %s364_s8 }
  0x11   : > { %s291_s10 = sshll.u32 (!%p141_p9), %s163_s9, 4  ;;  %s482_s24 = smov (!%p141_p9), [#allocation2]   ;;  %s569_s10 = int_to_ptr.vmem [resolvable:$true] %s291_s10 }
  0x12   : > { %s416_s20 = scalar_lea.vmem (!%p141_p9), %s569_s10, 256  ;;  %s420_s25 = sshll.u32 (!%p141_p9), %s482_s24, 4  ;;  %s421_s25 = int_to_ptr.vmem [resolvable:$false] %s420_s25 }
  0x13   : > { %p417_p11 = scmp.ne.s32.totalorder (!%p141_p9), %s569_s10, %s416_s20  ;;  %p423_p0 = scmp.lt.s32.totalorder (!%p141_p9), %s569_s10, %s421_s25 }
  0x15   : > { %s165_s26 = scalar_select %p164_p10, %s524_s16, 1 }
  0x16   : > { %s277_s16 = scalar_lea.sflag [#allocation3], %s161_s6  ;;  %p418_p12 = pnand %p417_p11, %p541_p5 }
  0x17   : > { %s373_s27 = smul.u32 80, %s165_s26  ;;  %s422_s26 = scalar_lea.vmem %s421_s25, 512 }
  0x18   : > { %p419_p13 = pneg %p418_p12  ;;  %p424_p1 = scmp.lt.s32.totalorder %s422_s26, %s416_s20 }
  0x19   : > { %s168_s30 = scalar_lea.vmem %s609_s0, %s373_s27 }
  0x1a   : > { %v171_v3 = vld [vmem:[%s168_s30 + $0x8] sm:$0xff]  ;;  %v173_v4 = vld [vmem:[%s168_s30 + $0x18] sm:$0xff]  ;;  %v170_v5 = vld [vmem:[%s168_s30] sm:$0xff]  ;;  %p425_p2 = por %p424_p1, %p423_p0 }
  0x1b   : > { %v365_v6 = vpack.c.bf16 %v173_v4, %v171_v3  ;;  %v172_v7 = vld [vmem:[%s168_s30 + $0x10] sm:$0xff]  ;;  %v175_v8 = vld [vmem:[%s168_s30 + $0x28] sm:$0xff]  ;;  %v177_v9 = vld [vmem:[%s168_s30 + $0x38] sm:$0xff] }
  0x1c   : > { %v367_v10 = vpack.c.bf16 %v172_v7, %v170_v5  ;;  %v369_v11 = vpack.c.bf16 %v177_v9, %v175_v8  ;;  %v174_v12 = vld [vmem:[%s168_s30 + $0x20] sm:$0xff]  ;;  %v176_v13 = vld [vmem:[%s168_s30 + $0x30] sm:$0xff]  ;;  %v179_v15 = vld [vmem:[%s168_s30 + $0x48] sm:$0xf]  ;;  %p426_p3 = pnand %p425_p2, %p419_p13 }
  0x1d   : > { %366 = vmatprep.subr.bf16.mxu0 %v365_v6  ;;  %v371_v14 = vpack.c.bf16 %v176_v13, %v174_v12  ;;  %v178_v16 = vld [vmem:[%s168_s30 + $0x40] sm:$0xf] }
  0x1e   : > { %368 = vmatpush1.bf16.msra.mxu0 %v367_v10 }
  0x1f   : > { %370 = vmatprep.subr.bf16.mxu0 %v369_v11 }
  0x22   : > { %372 = vmatpush1.bf16.msra.mxu0 %v371_v14 }
  0x23   : > { %356 = vmatprep.subr.msk.mxu0 %vm190_vm0, %v179_v15 }
  0x26   : > { %357 = vmatpush1.msk.msra.mxu0 %vm190_vm0, %v178_v16 }
  0x27   : > { %358 = vmatmul.mubr.msk.f32.vlgmr.msra.gmra.mrb[0].mxu0 %vm186_vm1, %v169_v17 }
  0x8e   : > { %v184_v18 = vpop.permute.xlu0 %183 }
  0xfa   : > { %v263_v19 = vpop.f32.mrb[0].mxu0 }
  0xfb   : > { %v264_v20 = vadd.f32 %v263_v19, %v184_v18  ;;  %v265_v21 = vpop.f32.mrb[1].mxu0 }
  0xfc   : > { %v266_v22 = vadd.f32 %v265_v21, %v184_v18 }
  0xfd   : > { %vm268_vm2 = vcmp.gt.f32.partialorder %v264_v20, 0.0  ;;  %v270_v23 = vmul.f32 0.2, %v264_v20 }
  0xfe   : > { %vm269_vm3 = vcmp.gt.f32.partialorder %v266_v22, 0.0  ;;  %v271_v24 = vmul.f32 0.2, %v266_v22 }
  0xff   : > { %v272_v25 = vsel %vm268_vm2, %v264_v20, %v270_v23 }
 0x100   : > { %v273_v26 = vsel %vm269_vm3, %v266_v22, %v271_v24  ;;  %274 = vst [vmem:[%s163_s9] sm:$0xff] %v272_v25 }
 0x101   : > { %275 = vst [vmem:[%s163_s9 + $0x8] sm:$0xff] %v273_v26 }
 0x102   : > { %429 = shalt.err (!%p426_p3)
}
 0x103   : > { %s430_s27 = scalar_lea.hbm %s567_s19, 256  ;;  %s434_s30 = scalar_lea.hbm %s612_s3, 512 }
 0x104   : > { %p431_p4 = scmp.ne.s32.totalorder %s567_s19, %s430_s27  ;;  %p435_p9 = scmp.lt.u32.totalorder %s567_s19, %s612_s3 }
 0x105   : > { %p436_p10 = scmp.lt.u32.totalorder %s434_s30, %s430_s27  ;;  %p438_p12 = scmp.lt.u32.totalorder %s430_s27, %s567_s19 }
 0x106   : > { %p432_p7 = pnand %p431_p4, %p541_p5 }
 0x107   : > { %p437_p11 = por %p436_p10, %p435_p9 }
 0x108   : > { %p433_p8 = pneg %p432_p7 }
 0x109   : > { %p439_p13 = por %p438_p12, %p437_p11 }
 0x10b   : > { %p440_p0 = pnand %p439_p13, %p433_p8 }
 0x10d   : > { %443 = shalt.err (!%p440_p0)
}
 0x10e   : > { %374 = dma.vmem_to_hbm [thread:$0]  (%p541_p5), %s569_s10, 256, %s567_s19, %s277_s16  }
 0x10f PF: > { %p380_p1 = scmp.ge.s32.totalorder %s478_s15, 2  ;;  %s303_s6 = sand.u32 1, %s466_s12  }
 0x110   : > { %s304_s7 = scalar_lea.sflag [#allocation3], %s303_s6 }
 0x111   : > { %p377_p2 = pnand %p380_p1, %p545_p6 }
 0x113   : > { %461 = dma.done.wait (!%p377_p2), %s304_s7, 256  }
 0x114   : > { %463 = vsyncadd (!%p377_p2), %s304_s7, 4294967040  ;;  %p13_p3 = scmp.ge.s32.totalorder %s528_s18, 4   ;;  %s615_s12 = smov %s470_s13 }
 0x115   : > { %s616_s13 = smov %s474_s14  ;;  %s617_s14 = smov %s539_s21 }
 0x116   : > { %s618_s15 = smov %s528_s18  ;;  %15 = sbr.rel (!%p13_p3) target bundleno = 3 (0x3), region = 67 }
 0x11d   :  { %309 = vsyncpa [#allocation3], 1 }
 0x11e   :  { %311 = vsyncpa [#allocation3 + $0x1], 1 }

</bundles_post_ra>
